<compile_context>
chip_gen: v6e
topology: v6e:2x2x1
jax: 0.10.0
libtpu: 0.0.40
codegen_flags: <defaults>
</compile_context>

<pallas_src>
import jax
import jax.numpy as jnp
from jax.experimental import pallas as pl
from jax.experimental.pallas import tpu as pltpu


def _embed_e_kernel(x_ref, w_ref, b_ref, o_ref):
    # x: (tm, K), w: (K, tn), b: (1, tn), o: (tm, tn)
    acc = jnp.dot(x_ref[...], w_ref[...], preferred_element_type=jnp.float32)
    acc = acc + b_ref[...].astype(jnp.float32)          # broadcast (1, tn)
    o_ref[...] = jnp.maximum(acc, 0.0).astype(o_ref.dtype)


def init_embed_e_params(weight, bias, param_dtype=None):
    """One-time parameter prep (amortized over all forward calls).

    weight: (N, l_in) PyTorch nn.Linear layout -> returned as (l_in, N).
    bias:   (N,)      -> returned as (1, N), kept in f32 (added to f32 acc).
    param_dtype: optional cast for the weight (e.g. jnp.bfloat16).
    """
    w_t = jnp.asarray(weight).T                          # paid once, not per call
    if param_dtype is not None:
        w_t = w_t.astype(param_dtype)
    b2d = jnp.asarray(bias).reshape(1, -1).astype(jnp.float32)
    return w_t, b2d


def _round_up(x, m):
    return ((x + m - 1) // m) * m


def embed_e_forward(h, w_t, b2d, *, tm_max=512, tn_max=1024,
                    vmem_budget_bytes=32 * 1024 * 1024):
    """h: (B, K) activations; w_t: (K, N) pre-transposed weight; b2d: (1, N)."""
    B, K = h.shape
    K2, N = w_t.shape
    assert K == K2 and b2d.shape == (1, N)

    # --- tile sizing --------------------------------------------------------
    sub = 16 if h.dtype == jnp.bfloat16 else 8           # sublane granularity
    tm = min(tm_max, _round_up(B, sub))
    # Lane-dense output: keep the full N per block unless N is large, in which
    # case use a multiple-of-128 tile (unmasked vst on the store path).
    tn = N if N <= tn_max else (tn_max - tn_max % 128)

    x_item = h.dtype.itemsize
    w_item = w_t.dtype.itemsize

    def footprint(tm_, tn_):
        # double-buffered x / w / bias / out tiles
        return 2 * (tm_ * K * x_item + K * tn_ * w_item
                    + tn_ * 4 + tm_ * tn_ * x_item)

    while footprint(tm, tn) > vmem_budget_bytes and tm > sub:
        tm = max(sub, tm // 2)
    while footprint(tm, tn) > vmem_budget_bytes and tn > 128:
        tn = max(128, tn // 2)
    if N % tn != 0:
        tn = N                    # fall back to full-N block (always valid)

    # Pad batch up to a multiple of tm (padded rows computed then dropped).
    Bp = _round_up(B, tm)
    if Bp != B:
        h = jnp.pad(h, ((0, Bp - B), (0, 0)))

    grid = (Bp // tm, N // tn)

    out = pl.pallas_call(
        _embed_e_kernel,
        out_shape=jax.ShapeDtypeStruct((Bp, N), h.dtype),
        grid=grid,
        in_specs=[
            pl.BlockSpec((tm, K), lambda i, j: (i, 0)),   # x: streams over M
            pl.BlockSpec((K, tn), lambda i, j: (0, j)),   # w: resident over M
            pl.BlockSpec((1, tn), lambda i, j: (0, j)),   # b: resident over M
        ],
        out_specs=pl.BlockSpec((tm, tn), lambda i, j: (i, j)),
        compiler_params=pltpu.CompilerParams(
            dimension_semantics=("parallel", "parallel"),
            vmem_limit_bytes=48 * 1024 * 1024,
        ),
    )(h, w_t, b2d)

    return out[:B] if Bp != B else out


if __name__ == "__main__":
    # Module hyper-params (small, TPU-tile friendly): out features N = 128.
    l_in, l_h, l_g = 32, 8, 16
    batch = 40                      # deliberately not a tile multiple

    key = jax.random.PRNGKey(0)
    k_x, k_w, k_b = jax.random.split(key, 3)

    h = jax.random.normal(k_x, (batch, l_in), dtype=jnp.float32)
    weight = jax.random.normal(k_w, (l_h * l_g, l_in), dtype=jnp.float32) * 0.05
    bias = jax.random.normal(k_b, (l_h * l_g,), dtype=jnp.float32) * 0.05

    ref = jnp.maximum(h @ weight.T + bias, 0.0)

    # f32 path, default tiling (single M tile at this tiny batch).
    w_t, b2d = init_embed_e_params(weight, bias)
    out = jax.block_until_ready(embed_e_forward(h, w_t, b2d))
    assert out.shape == (batch, l_h * l_g)
    assert jnp.allclose(out, ref, atol=1e-4, rtol=1e-4)

    # f32 path with a tiny tm to exercise the multi-step (pipelined) M grid
    # and the batch-padding path.
    out_tiled = jax.block_until_ready(embed_e_forward(h, w_t, b2d, tm_max=16))
    assert jnp.allclose(out_tiled, ref, atol=1e-4, rtol=1e-4)

    # bf16 weights/activations with f32 accumulation (bf16-native MXU path).
    w_bf, b_bf = init_embed_e_params(weight, bias, param_dtype=jnp.bfloat16)
    out_bf = jax.block_until_ready(
        embed_e_forward(h.astype(jnp.bfloat16), w_bf, b_bf))
    assert jnp.allclose(out_bf.astype(jnp.float32), ref, atol=5e-2, rtol=5e-2)

    print("KERNEL_OK")
</pallas_src>

<mosaic_0001>
module attributes {stable_mosaic.version = 11 : i64} {
  func.func @_embed_e_kernel(%arg0: i32, %arg1: i32, %arg2: memref<40x32xf32, #tpu.memory_space<vmem>>, %arg3: memref<32x128xf32, #tpu.memory_space<vmem>>, %arg4: memref<1x128xf32, #tpu.memory_space<vmem>>, %arg5: memref<40x128xf32, #tpu.memory_space<vmem>>) attributes {dimension_semantics = [#tpu.dimension_semantics<parallel>, #tpu.dimension_semantics<parallel>], iteration_bounds = array<i64: 1, 1>, scalar_prefetch = 0 : i64, scratch_operands = 0 : i64, tpu.core_type = #tpu.core_type<tc>, window_params = [{transform_indices = @transform_0, window_bounds = array<i64: 40, 32>}, {transform_indices = @transform_1, window_bounds = array<i64: 32, 128>}, {transform_indices = @transform_2, window_bounds = array<i64: 1, 128>}, {transform_indices = @transform_3, window_bounds = array<i64: 40, 128>}]} {
    %c0 = arith.constant 0 : index
    %c0_0 = arith.constant 0 : index
    %0 = vector.load %arg2[%c0, %c0_0] : memref<40x32xf32, #tpu.memory_space<vmem>>, vector<40x32xf32>
    %c0_1 = arith.constant 0 : index
    %c0_2 = arith.constant 0 : index
    %1 = vector.load %arg3[%c0_1, %c0_2] : memref<32x128xf32, #tpu.memory_space<vmem>>, vector<32x128xf32>
    %cst = arith.constant dense<0.000000e+00> : vector<40x128xf32>
    %2 = tpu.matmul %0, %1, %cst {dimension_numbers = #tpu.dot_dimension_numbers<[1], [0], [0], [1], [0, 0, 1, 1], [], []>} : vector<40x32xf32>, vector<32x128xf32>, vector<40x128xf32> -> vector<40x128xf32>
    %c0_3 = arith.constant 0 : index
    %c0_4 = arith.constant 0 : index
    %3 = vector.load %arg4[%c0_3, %c0_4] : memref<1x128xf32, #tpu.memory_space<vmem>>, vector<1x128xf32>
    %4 = vector.broadcast %3 : vector<1x128xf32> to vector<40x128xf32>
    %5 = arith.addf %2, %4 : vector<40x128xf32>
    %cst_5 = arith.constant 0.000000e+00 : f32
    %6 = vector.broadcast %cst_5 : f32 to vector<40x128xf32>
    %7 = arith.maximumf %5, %6 : vector<40x128xf32>
    %c0_6 = arith.constant 0 : index
    %c0_7 = arith.constant 0 : index
    %8 = vector.load %arg5[%c0_6, %c0_7] : memref<40x128xf32, #tpu.memory_space<vmem>>, vector<40x128xf32>
    tpu.vector_store %arg5[%c0_6, %c0_7], %7 {strides = array<i32>} : memref<40x128xf32, #tpu.memory_space<vmem>>, vector<40x128xf32>,
    return
  }
  func.func @transform_0(%arg0: i32, %arg1: i32) -> (i32, i32) {
    %c0_i32 = arith.constant 0 : i32
    %c0_i32_0 = arith.constant 0 : i32
    return %arg0, %c0_i32 : i32, i32
  }
  func.func @transform_1(%arg0: i32, %arg1: i32) -> (i32, i32) {
    %c0_i32 = arith.constant 0 : i32
    %c0_i32_0 = arith.constant 0 : i32
    return %c0_i32, %arg1 : i32, i32
  }
  func.func @transform_2(%arg0: i32, %arg1: i32) -> (i32, i32) {
    %c0_i32 = arith.constant 0 : i32
    %c0_i32_0 = arith.constant 0 : i32
    return %c0_i32, %arg1 : i32, i32
  }
  func.func @transform_3(%arg0: i32, %arg1: i32) -> (i32, i32) {
    %c0_i32 = arith.constant 0 : i32
    return %arg0, %arg1 : i32, i32
  }
}

</mosaic_0001>

<bundles_post_ra>
// kernel: tpu_custom_call.1
= control target key start
LH: loop header
LB: loop body
LE: loop exit
PB: predicated region body
PF: predicated region fallthrough
CT: control target
= control target key end

     0   :  { %v236_v1 = vmov 0.0   ;;  %s299_s0 = inlined_call_operand.vmem [shape: f32[40,32], index: 0, kind: input, shape index: {}]   ;;  %s300_s1 = inlined_call_operand.vmem [shape: f32[32,128], index: 1, kind: input, shape index: {}]   ;;  %s301_s2 = inlined_call_operand.vmem [shape: f32[1,128], index: 2, kind: input, shape index: {}]   ;;  %s302_s3 = inlined_call_operand.hbm [shape: f32[40,128], index: 3, kind: output, shape index: {}]  }
   0x1   :  { %v23_v0 = vld [vmem:[%s300_s1 + $0x18] sm:$0xff]  ;;  %178 = vmatprep.subr.mxu0 %v236_v1  ;;  %201 = vmatprep.subr.mxu1 %v236_v1  ;;  %v22_v2 = vld [vmem:[%s300_s1 + $0x10] sm:$0xff]  ;;  %v21_v3 = vld [vmem:[%s300_s1 + $0x8] sm:$0xff] }
   0x2   :  { %179 = vmatpush3.msra.mxu0 %v23_v0  ;;  %205 = vmatpush3.msra.mxu1 %v23_v0 }
   0x3   :  { %180 = vmatprep.subr.mxu0 %v236_v1  ;;  %202 = vmatprep.subr.mxu1 %v236_v1 }
   0x4   :  { %8 = vsyncpa [#allocation3], 0  ;;  %181 = vmatpush3.msra.mxu0 %v22_v2  ;;  %206 = vmatpush3.msra.mxu1 %v22_v2  ;;  %v20_v4 = vld [vmem:[%s300_s1] sm:$0xff]  ;;  %vm31_vm0 = vcmask 261120   ;;  %vm237_vm1 = vmmov 0   ;;  %v18_v6 = vld [vmem:[%s299_s0 + $0x18] sm:$0xff] }
   0x5   :  { %182 = vmatprep.subr.mxu0 %v236_v1  ;;  %203 = vmatprep.subr.mxu1 %v236_v1  ;;  %v15_v5 = vld [vmem:[%s299_s0] sm:$0xff]  ;;  %v16_v7 = vld [vmem:[%s299_s0 + $0x8] sm:$0xff]  ;;  %v17_v9 = vld [vmem:[%s299_s0 + $0x10] sm:$0xff] }
   0x6   :  { %183 = vmatpush3.msra.mxu0 %v21_v3  ;;  %207 = vmatpush3.msra.mxu1 %v21_v3  ;;  %v19_v8 = vld [vmem:[%s299_s0 + $0x20] sm:$0xff]  ;;  %s238_s0 = smov [#allocation2]  }
   0x7   :  { %184 = vmatprep.subr.mxu0 %v236_v1  ;;  %186 = vmatprep.mubr.msk.f32.mxu0 %vm237_vm1, %v236_v1  ;;  %v163_v10 = vld [vmem:[%s301_s2] ss:$0 sm:$0xff]  ;;  %s152_s4 = sshll.u32 %s238_s0, 4  ;;  %s153_s4 = int_to_ptr.vmem [resolvable:$true] %s152_s4 }
   0x8   :  { %185 = vmatpush3.msra.mxu0 %v20_v4  ;;  %204 = vmatprep.subr.mxu1 %v236_v1  ;;  %s214_s2 = scalar_lea.vmem %s153_s4, 640  ;;  %p219_p1 = scmp.lt.s32.totalorder %s153_s4, %s153_s4 }
   0x9   :  { %187 = vmatmul.mubr.msk.f32.vlgmr.msra.gmra.mxu0 %vm31_vm0, %v15_v5  ;;  %208 = vmatpush3.msra.mxu1 %v20_v4  ;;  %p215_p0 = scmp.ne.s32.totalorder %s153_s4, %s214_s2  ;;  %p220_p2 = scmp.lt.s32.totalorder %s214_s2, %s214_s2 }
   0xa   :  { %195 = vmatprep.mubr.msk.f32.mxu1 %vm237_vm1, %v236_v1  ;;  %189 = vmatprep.mubr.msk.f32.mxu0 %vm237_vm1, %v236_v1 }
   0xb   :  { %196 = vmatmul.mubr.msk.f32.vlgmr.msra.gmra.mxu1 %vm31_vm0, %v18_v6  ;;  %p221_p3 = por %p220_p2, %p219_p1 }
   0xc   :  { %198 = vmatprep.mubr.msk.f32.mxu1 %vm237_vm1, %v236_v1 }
   0xd   :  { %190 = vmatmul.mubr.msk.f32.gmra.mxu0 %vm31_vm0, %v16_v7  ;;  %p222_p4 = pnand %p221_p3, %p215_p0 }
   0xe   :  { %192 = vmatprep.mubr.msk.f32.mxu0 %vm237_vm1, %v236_v1 }
   0xf   :  { %199 = vmatmul.mubr.msk.f32.gmra.mxu1 %vm31_vm0, %v19_v8 }
  0x11   :  { %193 = vmatmul.mubr.msk.f32.gmra.mxu0 %vm31_vm0, %v17_v9 }
  0xc9   :  { %v113_v11 = vpop.f32.mrf.mxu0 }
  0xca   :  { %v114_v12 = vadd.f32 %v163_v10, %v113_v11 }
  0xcb   :  { %v188_v13 = vpop.f32.mrf.mxu0  ;;  %v128_v14 = vpop.f32.mrf.mxu1 }
  0xcc   :  { %v137_v15 = vmax.f32 %v114_v12, 0.0  ;;  %v129_v16 = vadd.f32 %v163_v10, %v128_v14 }
  0xcd   :  { %v118_v17 = vpop.f32.mrf.mxu0  ;;  %v197_v18 = vpop.f32.mrf.mxu1 }
  0xce   :  { %142 = vst [vmem:[#allocation2] sm:$0xff] %v137_v15  ;;  %v140_v19 = vmax.f32 %v129_v16, 0.0  ;;  %v119_v20 = vadd.f32 %v163_v10, %v118_v17 }
  0xcf   :  { %v191_v21 = vpop.f32.mrf.mxu0  ;;  %v133_v22 = vpop.f32.mrf.mxu1 }
  0xd0   :  { %145 = vst [vmem:[#allocation2 + $0x18] sm:$0xff] %v140_v19  ;;  %v138_v23 = vmax.f32 %v119_v20, 0.0  ;;  %v134_v24 = vadd.f32 %v163_v10, %v133_v22 }
  0xd1   :  { %v123_v25 = vpop.f32.mrf.mxu0  ;;  %v200_v26 = vpop.f32.mrf.mxu1 }
  0xd2   :  { %143 = vst [vmem:[#allocation2 + $0x8] sm:$0xff] %v138_v23  ;;  %v141_v27 = vmax.f32 %v134_v24, 0.0  ;;  %v124_v28 = vadd.f32 %v163_v10, %v123_v25 }
  0xd3   :  { %v194_v29 = vpop.f32.mrf.mxu0 }
  0xd4   :  { %146 = vst [vmem:[#allocation2 + $0x20] sm:$0xff] %v141_v27  ;;  %v139_v30 = vmax.f32 %v124_v28, 0.0 }
  0xd6   :  { %144 = vst [vmem:[#allocation2 + $0x10] sm:$0xff] %v139_v30 }
  0xd7   :  { %225 = shalt.err (!%p222_p4)
}
  0xd8   :  { %s239_s5 = smov 128   ;;  %s240_s6 = smov 8  }
  0xd9   :  { %158 = dma.vmem_to_hbm [thread:$0]  %s153_s4, 640, %s302_s3, [#allocation3], %s239_s5, %s239_s5, %s240_s6  }
  0xda   :  { %234 = dma.done.wait [#allocation3], 640  }
  0xdb   :  { %235 = vsyncadd [#allocation3], 4294966656 }
  0xdc   :  { %162 = vsyncpa [#allocation3], 1 }

</bundles_post_ra>
